<compile_context>
chip_gen: v7x
topology: tpu7x:2x2x1
jax: 0.10.0
libtpu: 0.0.40
codegen_flags: <defaults>
</compile_context>

<pallas_src>
import functools

import jax
import jax.numpy as jnp
from jax.experimental import pallas as pl
from jax.experimental.pallas import tpu as pltpu


def _round_up(x, m):
    return ((x + m - 1) // m) * m


def _cdiv(a, b):
    return -(-a // b)


# ----------------------------- Pallas kernel ------------------------------ #

def _tcn_fused_kernel(*refs, layer_cfgs):
    """Fused TCN forward for one tile of TB (batch*node) rows.

    refs = (x_ref, w_0, b_0, w_1, b_1, ..., o_ref)
      x_ref : (TB, S, C_in)            fp32 input rows
      w_i   : (K_i, C_in_i, P_out_i)   bf16 weights; tap index j <-> causal
                                       shift j*d_i; C_out zero-padded to 128*
      b_i   : (1, P_out_i)             fp32 bias (zero-padded)
      o_ref : (TB, S, P_final)         fp32 output rows (lane-dense)
    layer_cfgs: tuple of (kernel_size, dilation, apply_relu) per layer; the
                1x1 readout is just a kernel_size==1 layer without ReLU.
    """
    x_ref = refs[0]
    o_ref = refs[-1]
    wb_refs = refs[1:-1]

    tb, seq, c_in = x_ref.shape
    m = tb * seq

    # Time index within each (batch*node) row; shared by every causal mask.
    t_idx = jax.lax.broadcasted_iota(jnp.int32, (m, 1), 0) % seq

    # Flat (TB*S, C) activations: temporal shifts become plain sublane rolls,
    # wrapped/leaked positions (t < shift, incl. cross-row leakage) are masked.
    h = x_ref[...].reshape(m, c_in)                         # fp32

    for li, (ksize, dil, relu) in enumerate(layer_cfgs):
        w_ref = wb_refs[2 * li]
        b_ref = wb_refs[2 * li + 1]

        # Tap j reads h shifted back in time by j*dil (zeros in the causal
        # pad region): roll rides the XLU, the mask is a VPU select, and the
        # K matmuls accumulate in fp32 on the MXU (bf16 operands).
        acc = jnp.dot(h.astype(jnp.bfloat16), w_ref[0],
                      preferred_element_type=jnp.float32)
        for j in range(1, ksize):
            shift = j * dil
            if shift >= seq:
                continue            # tap lies entirely in the causal pad
            shifted = pltpu.roll(h, shift, axis=0)
            shifted = jnp.where(t_idx >= shift, shifted, 0.0)
            acc = acc + jnp.dot(shifted.astype(jnp.bfloat16), w_ref[j],
                                preferred_element_type=jnp.float32)
        acc = acc + b_ref[...]
        if relu:
            acc = jnp.maximum(acc, 0.0)
        h = acc                                             # fp32 activations

    o_ref[...] = h.reshape(tb, seq, o_ref.shape[-1]).astype(o_ref.dtype)


# ------------------------------ Host wrapper ------------------------------- #

def _pick_tile_rows(bn, seq, widths, *, target_rows=2048,
                    act_budget_bytes=6 << 20):
    """(batch*node) rows per grid step."""
    # fp32 upper bound on per-row live bytes inside one grid step
    # (input + output blocks, fp32 accumulator, per-layer activations).
    per_row = 4 * seq * (widths[0] + widths[-1] + max(widths) + sum(widths[1:]))
    tb = max(1, min(act_budget_bytes // max(per_row, 1),
                    max(1, target_rows // max(seq, 1))))
    tb = min(tb, bn)
    if tb >= 8:
        tb = (tb // 8) * 8
    # v7x megacore: keep >= 2 grid steps whenever there is enough work so the
    # 'parallel' grid axis can shard across both TensorCores.
    if bn > 8 and _cdiv(bn, tb) < 2:
        tb = max(8, _round_up(_cdiv(bn, 2), 8))
    return tb


def tcn_forward_pallas(x_rows, kernel_layers, out_channels, *,
                       target_rows=2048):
    """Run the fused TCN over x_rows of shape (BN, S, C_in).

    kernel_layers: list of (w (K, C_in_i, P_out_i) bf16, b (1, P_out_i) fp32,
                            kernel_size, dilation, apply_relu).
    Returns (BN, S, out_channels) fp32 (padded channels sliced off).
    """
    BN, S, C_in = x_rows.shape
    p_final = kernel_layers[-1][0].shape[-1]
    widths = [C_in] + [w.shape[-1] for (w, _, _, _, _) in kernel_layers]

    TB = _pick_tile_rows(BN, S, widths, target_rows=target_rows)
    n_tiles = _cdiv(BN, TB)
    BN_pad = n_tiles * TB
    if BN_pad != BN:
        x_rows = jnp.pad(x_rows, ((0, BN_pad - BN), (0, 0), (0, 0)))

    layer_cfgs = tuple((k, d, relu) for (_, _, k, d, relu) in kernel_layers)
    kernel = functools.partial(_tcn_fused_kernel, layer_cfgs=layer_cfgs)

    in_specs = [pl.BlockSpec((TB, S, C_in), lambda i: (i, 0, 0))]
    operands = [x_rows]
    for (w, b, _, _, _) in kernel_layers:
        # Constant index_maps -> weights / biases stay VMEM-resident.
        in_specs.append(pl.BlockSpec(w.shape, lambda i: (0, 0, 0)))
        in_specs.append(pl.BlockSpec(b.shape, lambda i: (0, 0)))
        operands.extend([w, b])

    # Explicit scoped-VMEM limit: the binding default is 16 MiB on v5e /
    # 32 MiB on v6e+v7x (not the physical size).  Per-step footprint is
    # budgeted well below this by _pick_tile_rows; 48 MiB stays safe on
    # v7x's 64 MiB physical VMEM.
    per_row = 4 * S * (widths[0] + widths[-1] + max(widths) + sum(widths[1:]))
    w_bytes = sum(int(w.size) * 2 + int(b.size) * 4
                  for (w, b, _, _, _) in kernel_layers)
    est = 2 * TB * per_row + 2 * w_bytes + (4 << 20)
    vmem_limit = int(min(max(est, 32 << 20), 48 << 20))

    out = pl.pallas_call(
        kernel,
        out_shape=jax.ShapeDtypeStruct((BN_pad, S, p_final), x_rows.dtype),
        grid_spec=pltpu.PrefetchScalarGridSpec(
            num_scalar_prefetch=0,
            grid=(n_tiles,),
            in_specs=in_specs,
            out_specs=pl.BlockSpec((TB, S, p_final), lambda i: (i, 0, 0)),
        ),
        compiler_params=pltpu.CompilerParams(
            dimension_semantics=("parallel",),
            vmem_limit_bytes=vmem_limit),
    )(*operands)
    return out[:BN, :, :out_channels]


# --------------------------- Module-level wrapper -------------------------- #

class TemporalConvNetPallas:
    """JAX/Pallas equivalent of tsl TemporalConvNet (defaults path)."""

    def __init__(self, key, input_channels, hidden_channels, kernel_size,
                 dilation, stride=1, exog_channels=None, output_channels=None,
                 n_layers=1, exponential_dilation=False, causal_padding=True,
                 bias=True, channel_last=True):
        assert stride == 1, "only stride=1 supported"
        # TODO(synk): causal_padding=False (valid conv) not implemented.
        assert causal_padding, "only causal padding supported"
        self.channel_last = channel_last
        if exog_channels is not None:
            input_channels += exog_channels

        self.layers = []  # fp32 (w (K, C_in, C_out), b (C_out,), dilation)
        d = dilation
        for i in range(n_layers):
            if exponential_dilation:
                d = dilation ** i
            c_in = input_channels if i == 0 else hidden_channels
            key, kw, kb = jax.random.split(key, 3)
            bound = 1.0 / (c_in * kernel_size) ** 0.5   # torch Conv2d default
            w = jax.random.uniform(kw, (kernel_size, c_in, hidden_channels),
                                   jnp.float32, -bound, bound)
            if bias:
                b = jax.random.uniform(kb, (hidden_channels,), jnp.float32,
                                       -bound, bound)
            else:
                b = jnp.zeros((hidden_channels,), jnp.float32)
            self.layers.append((w, b, d))

        self.readout = None
        if output_channels is not None:
            key, kw, kb = jax.random.split(key, 3)
            bound = 1.0 / hidden_channels ** 0.5
            w = jax.random.uniform(kw, (1, hidden_channels, output_channels),
                                   jnp.float32, -bound, bound)
            b = jax.random.uniform(kb, (output_channels,), jnp.float32,
                                   -bound, bound)
            self.readout = (w, b)

        # ---- pack parameters for the fused kernel -------------------------
        # Weights are stored tap-reversed (index j <-> causal shift j*dil) and
        # the output-channel dim (hence the next layer's contraction dim) is
        # zero-padded to a multiple of 128 so every in-kernel result / store
        # is lane-dense.  Layer-0 keeps the true C_in (the input itself is
        # never padded).
        self._kernel_layers = []
        c_prev = input_channels
        for (w, b, dd) in self.layers:
            K, c_in, c_out = w.shape
            c_out_pad = _round_up(c_out, 128)
            w_p = jnp.zeros((K, c_prev, c_out_pad), jnp.float32)
            w_p = w_p.at[:, :c_in, :c_out].set(w[::-1])
            b_p = jnp.zeros((1, c_out_pad), jnp.float32).at[0, :c_out].set(b)
            self._kernel_layers.append(
                (w_p.astype(jnp.bfloat16), b_p, K, dd, True))
            c_prev = c_out_pad

        self._out_channels = hidden_channels
        if self.readout is not None:
            w, b = self.readout                      # (1, hidden, out)
            c_out = w.shape[2]
            c_out_pad = _round_up(c_out, 128)
            w_p = jnp.zeros((1, c_prev, c_out_pad), jnp.float32)
            w_p = w_p.at[:, :w.shape[1], :c_out].set(w)
            b_p = jnp.zeros((1, c_out_pad), jnp.float32).at[0, :c_out].set(b)
            self._kernel_layers.append(
                (w_p.astype(jnp.bfloat16), b_p, 1, 1, False))
            self._out_channels = c_out

    def __call__(self, x, u=None):
        # x: (b, s, n, c) when channel_last; (b, c, n, s) otherwise.
        if u is not None:
            x = jnp.concatenate([x, u], axis=-1 if self.channel_last else 1)
        if not self.channel_last:
            x = jnp.transpose(x, (0, 3, 2, 1))                 # -> (b, s, n, c)
        B, S, N, C = x.shape
        rows = jnp.transpose(x, (0, 2, 1, 3)).reshape(B * N, S, C)
        rows = tcn_forward_pallas(rows, self._kernel_layers, self._out_channels)
        out = rows.reshape(B, N, S, -1).transpose(0, 2, 1, 3)  # (b, s, n, c)
        if not self.channel_last:
            out = jnp.transpose(out, (0, 3, 2, 1))             # -> (b, c, n, s)
        return out


# ------------------------------ Reference ---------------------------------- #

def _reference_forward(x_bsnc, model):
    """Pure-JAX fp32 mirror of the PyTorch forward (NCHW conv) for validation."""
    x = jnp.transpose(x_bsnc, (0, 3, 2, 1))  # b s n c -> b c n s

    def apply_conv(x, w, b, dil, relu):
        K = w.shape[0]
        pad = (K - 1) * dil
        xp = jnp.pad(x, ((0, 0), (0, 0), (0, 0), (pad, 0)))
        w_t = jnp.transpose(w, (2, 1, 0))[:, :, None, :]   # OIHW, H=1, W=K
        y = jax.lax.conv_general_dilated(
            xp, w_t, window_strides=(1, 1), padding='VALID',
            rhs_dilation=(1, dil),
            dimension_numbers=('NCHW', 'OIHW', 'NCHW'))
        y = y + b[None, :, None, None]
        return jnp.maximum(y, 0.0) if relu else y

    for (w, b, d) in model.layers:
        x = apply_conv(x, w, b, d, True)
    if model.readout is not None:
        w, b = model.readout
        x = apply_conv(x, w, b, 1, False)
    return jnp.transpose(x, (0, 3, 2, 1))  # b c n s -> b s n c


# --------------------------------- Main ------------------------------------ #

if __name__ == "__main__":
    key = jax.random.PRNGKey(0)
    k_in, k_model = jax.random.split(key)

    B, S, N, C_in = 2, 16, 3, 4            # (batch, steps, nodes, channels)
    hidden, C_out, K, dil, n_layers = 32, 8, 3, 2, 2

    x = jax.random.normal(k_in, (B, S, N, C_in), jnp.float32)

    model = TemporalConvNetPallas(
        k_model, input_channels=C_in, hidden_channels=hidden,
        kernel_size=K, dilation=dil, output_channels=C_out,
        n_layers=n_layers, exponential_dilation=False,
        causal_padding=True, bias=True, channel_last=True)

    out = jax.block_until_ready(model(x))
    ref = jax.block_until_ready(_reference_forward(x, model))

    assert out.shape == (B, S, N, C_out), out.shape
    # bf16 matmul inputs with fp32 accumulation -> small error vs fp32 ref.
    max_err = float(jnp.max(jnp.abs(out - ref)))
    assert jnp.allclose(out, ref, atol=5e-2, rtol=5e-2), max_err

    print("KERNEL_OK")
</pallas_src>

<mosaic_0001>
module attributes {stable_mosaic.version = 11 : i64} {
  func.func @_tcn_fused_kernel(%arg0: i32, %arg1: memref<6x16x4xf32, #tpu.memory_space<vmem>>, %arg2: memref<3x4x128xbf16, #tpu.memory_space<vmem>>, %arg3: memref<1x128xf32, #tpu.memory_space<vmem>>, %arg4: memref<3x128x128xbf16, #tpu.memory_space<vmem>>, %arg5: memref<1x128xf32, #tpu.memory_space<vmem>>, %arg6: memref<1x128x128xbf16, #tpu.memory_space<vmem>>, %arg7: memref<1x128xf32, #tpu.memory_space<vmem>>, %arg8: memref<6x16x128xf32, #tpu.memory_space<vmem>>) attributes {dimension_semantics = [#tpu.dimension_semantics<parallel>], iteration_bounds = array<i64: 1>, scalar_prefetch = 0 : i64, scratch_operands = 0 : i64, tpu.core_type = #tpu.core_type<tc>, window_params = [{transform_indices = @transform_0, window_bounds = array<i64: 6, 16, 4>}, {pipeline_mode = #tpu.pipeline_mode<synchronous>, transform_indices = @transform_1, window_bounds = array<i64: 3, 4, 128>}, {pipeline_mode = #tpu.pipeline_mode<synchronous>, transform_indices = @transform_2, window_bounds = array<i64: 1, 128>}, {pipeline_mode = #tpu.pipeline_mode<synchronous>, transform_indices = @transform_3, window_bounds = array<i64: 3, 128, 128>}, {pipeline_mode = #tpu.pipeline_mode<synchronous>, transform_indices = @transform_4, window_bounds = array<i64: 1, 128>}, {pipeline_mode = #tpu.pipeline_mode<synchronous>, transform_indices = @transform_5, window_bounds = array<i64: 1, 128, 128>}, {pipeline_mode = #tpu.pipeline_mode<synchronous>, transform_indices = @transform_6, window_bounds = array<i64: 1, 128>}, {transform_indices = @transform_7, window_bounds = array<i64: 6, 16, 128>}]} {
    %0 = tpu.iota {dimensions = array<i32: 0>} : vector<96x1xi32>
    %c16_i32 = arith.constant 16 : i32
    %c0_i32 = arith.constant 0 : i32
    %1 = arith.cmpi eq, %c16_i32, %c0_i32 : i32
    %c1_i32 = arith.constant 1 : i32
    %2 = arith.select %1, %c1_i32, %c16_i32 : i32
    %3 = vector.broadcast %2 : i32 to vector<96x1xi32>
    %4 = arith.remsi %0, %3 : vector<96x1xi32>
    %c0_i32_0 = arith.constant 0 : i32
    %5 = vector.broadcast %c0_i32_0 : i32 to vector<96x1xi32>
    %6 = arith.cmpi ne, %4, %5 : vector<96x1xi32>
    %c0_i32_1 = arith.constant 0 : i32
    %7 = vector.broadcast %c0_i32_1 : i32 to vector<96x1xi32>
    %8 = arith.cmpi slt, %4, %7 : vector<96x1xi32>
    %c0_i32_2 = arith.constant 0 : i32
    %9 = arith.cmpi slt, %2, %c0_i32_2 : i32
    %10 = vector.broadcast %9 : i1 to vector<96x1xi1>
    %11 = vector.broadcast %10 : vector<96x1xi1> to vector<96x1xi1>
    %12 = arith.xori %8, %11 : vector<96x1xi1>
    %13 = arith.andi %12, %6 : vector<96x1xi1>
    %14 = vector.broadcast %2 : i32 to vector<96x1xi32>
    %15 = arith.addi %4, %14 : vector<96x1xi32>
    %16 = arith.select %13, %15, %4 : vector<96x1xi1>, vector<96x1xi32>
    %c0 = arith.constant 0 : index
    %c0_3 = arith.constant 0 : index
    %c0_4 = arith.constant 0 : index
    %17 = vector.load %arg1[%c0, %c0_3, %c0_4] : memref<6x16x4xf32, #tpu.memory_space<vmem>>, vector<6x16x4xf32>
    %18 = vector.shape_cast %17 : vector<6x16x4xf32> to vector<96x4xf32>
    %19 = arith.truncf %18 : vector<96x4xf32> to vector<96x4xbf16>
    %c0_5 = arith.constant 0 : index
    %c0_6 = arith.constant 0 : index
    %c0_7 = arith.constant 0 : index
    %20 = vector.load %arg2[%c0_5, %c0_6, %c0_7] : memref<3x4x128xbf16, #tpu.memory_space<vmem>>, vector<1x4x128xbf16>
    %21 = vector.shape_cast %20 : vector<1x4x128xbf16> to vector<4x128xbf16>
    %cst = arith.constant dense<0.000000e+00> : vector<96x128xf32>
    %22 = tpu.matmul %19, %21, %cst {dimension_numbers = #tpu.dot_dimension_numbers<[1], [0], [0], [1], [0, 0, 1, 1], [], []>} : vector<96x4xbf16>, vector<4x128xbf16>, vector<96x128xf32> -> vector<96x128xf32>
    %c2_i32 = arith.constant 2 : i32
    %23 = tpu.dynamic_rotate %18 by %c2_i32 dim 0 : vector<96x4xf32>, i32 -> vector<96x4xf32>
    %c2_i32_8 = arith.constant 2 : i32
    %24 = vector.broadcast %c2_i32_8 : i32 to vector<96x1xi32>
    %25 = arith.cmpi sge, %16, %24 : vector<96x1xi32>
    %cst_9 = arith.constant 0.000000e+00 : f32
    %26 = vector.shape_cast %25 : vector<96x1xi1> to vector<96x1xi1>
    %27 = vector.broadcast %26 : vector<96x1xi1> to vector<96x4xi1>
    %28 = vector.broadcast %cst_9 : f32 to vector<96x4xf32>
    %29 = arith.select %27, %23, %28 : vector<96x4xi1>, vector<96x4xf32>
    %30 = arith.truncf %29 : vector<96x4xf32> to vector<96x4xbf16>
    %c1 = arith.constant 1 : index
    %c0_10 = arith.constant 0 : index
    %c0_11 = arith.constant 0 : index
    %31 = vector.load %arg2[%c1, %c0_10, %c0_11] : memref<3x4x128xbf16, #tpu.memory_space<vmem>>, vector<1x4x128xbf16>
    %32 = vector.shape_cast %31 : vector<1x4x128xbf16> to vector<4x128xbf16>
    %cst_12 = arith.constant dense<0.000000e+00> : vector<96x128xf32>
    %33 = tpu.matmul %30, %32, %cst_12 {dimension_numbers = #tpu.dot_dimension_numbers<[1], [0], [0], [1], [0, 0, 1, 1], [], []>} : vector<96x4xbf16>, vector<4x128xbf16>, vector<96x128xf32> -> vector<96x128xf32>
    %34 = arith.addf %22, %33 : vector<96x128xf32>
    %c4_i32 = arith.constant 4 : i32
    %35 = tpu.dynamic_rotate %18 by %c4_i32 dim 0 : vector<96x4xf32>, i32 -> vector<96x4xf32>
    %c4_i32_13 = arith.constant 4 : i32
    %36 = vector.broadcast %c4_i32_13 : i32 to vector<96x1xi32>
    %37 = arith.cmpi sge, %16, %36 : vector<96x1xi32>
    %cst_14 = arith.constant 0.000000e+00 : f32
    %38 = vector.shape_cast %37 : vector<96x1xi1> to vector<96x1xi1>
    %39 = vector.broadcast %38 : vector<96x1xi1> to vector<96x4xi1>
    %40 = vector.broadcast %cst_14 : f32 to vector<96x4xf32>
    %41 = arith.select %39, %35, %40 : vector<96x4xi1>, vector<96x4xf32>
    %42 = arith.truncf %41 : vector<96x4xf32> to vector<96x4xbf16>
    %c2 = arith.constant 2 : index
    %c0_15 = arith.constant 0 : index
    %c0_16 = arith.constant 0 : index
    %43 = vector.load %arg2[%c2, %c0_15, %c0_16] : memref<3x4x128xbf16, #tpu.memory_space<vmem>>, vector<1x4x128xbf16>
    %44 = vector.shape_cast %43 : vector<1x4x128xbf16> to vector<4x128xbf16>
    %cst_17 = arith.constant dense<0.000000e+00> : vector<96x128xf32>
    %45 = tpu.matmul %42, %44, %cst_17 {dimension_numbers = #tpu.dot_dimension_numbers<[1], [0], [0], [1], [0, 0, 1, 1], [], []>} : vector<96x4xbf16>, vector<4x128xbf16>, vector<96x128xf32> -> vector<96x128xf32>
    %46 = arith.addf %34, %45 : vector<96x128xf32>
    %c0_18 = arith.constant 0 : index
    %c0_19 = arith.constant 0 : index
    %47 = vector.load %arg3[%c0_18, %c0_19] : memref<1x128xf32, #tpu.memory_space<vmem>>, vector<1x128xf32>
    %48 = vector.broadcast %47 : vector<1x128xf32> to vector<96x128xf32>
    %49 = arith.addf %46, %48 : vector<96x128xf32>
    %cst_20 = arith.constant 0.000000e+00 : f32
    %50 = vector.broadcast %cst_20 : f32 to vector<96x128xf32>
    %51 = arith.maximumf %49, %50 : vector<96x128xf32>
    %52 = arith.truncf %51 : vector<96x128xf32> to vector<96x128xbf16>
    %c0_21 = arith.constant 0 : index
    %c0_22 = arith.constant 0 : index
    %c0_23 = arith.constant 0 : index
    %53 = vector.load %arg4[%c0_21, %c0_22, %c0_23] : memref<3x128x128xbf16, #tpu.memory_space<vmem>>, vector<1x128x128xbf16>
    %54 = vector.shape_cast %53 : vector<1x128x128xbf16> to vector<128x128xbf16>
    %cst_24 = arith.constant dense<0.000000e+00> : vector<96x128xf32>
    %55 = tpu.matmul %52, %54, %cst_24 {dimension_numbers = #tpu.dot_dimension_numbers<[1], [0], [0], [1], [0, 0, 1, 1], [], []>} : vector<96x128xbf16>, vector<128x128xbf16>, vector<96x128xf32> -> vector<96x128xf32>
    %c2_i32_25 = arith.constant 2 : i32
    %56 = tpu.dynamic_rotate %51 by %c2_i32_25 dim 0 : vector<96x128xf32>, i32 -> vector<96x128xf32>
    %c2_i32_26 = arith.constant 2 : i32
    %57 = vector.broadcast %c2_i32_26 : i32 to vector<96x1xi32>
    %58 = arith.cmpi sge, %16, %57 : vector<96x1xi32>
    %cst_27 = arith.constant 0.000000e+00 : f32
    %59 = vector.shape_cast %58 : vector<96x1xi1> to vector<96x1xi1>
    %60 = vector.broadcast %59 : vector<96x1xi1> to vector<96x128xi1>
    %61 = vector.broadcast %cst_27 : f32 to vector<96x128xf32>
    %62 = arith.select %60, %56, %61 : vector<96x128xi1>, vector<96x128xf32>
    %63 = arith.truncf %62 : vector<96x128xf32> to vector<96x128xbf16>
    %c1_28 = arith.constant 1 : index
    %c0_29 = arith.constant 0 : index
    %c0_30 = arith.constant 0 : index
    %64 = vector.load %arg4[%c1_28, %c0_29, %c0_30] : memref<3x128x128xbf16, #tpu.memory_space<vmem>>, vector<1x128x128xbf16>
    %65 = vector.shape_cast %64 : vector<1x128x128xbf16> to vector<128x128xbf16>
    %cst_31 = arith.constant dense<0.000000e+00> : vector<96x128xf32>
    %66 = tpu.matmul %63, %65, %cst_31 {dimension_numbers = #tpu.dot_dimension_numbers<[1], [0], [0], [1], [0, 0, 1, 1], [], []>} : vector<96x128xbf16>, vector<128x128xbf16>, vector<96x128xf32> -> vector<96x128xf32>
    %67 = arith.addf %55, %66 : vector<96x128xf32>
    %c4_i32_32 = arith.constant 4 : i32
    %68 = tpu.dynamic_rotate %51 by %c4_i32_32 dim 0 : vector<96x128xf32>, i32 -> vector<96x128xf32>
    %c4_i32_33 = arith.constant 4 : i32
    %69 = vector.broadcast %c4_i32_33 : i32 to vector<96x1xi32>
    %70 = arith.cmpi sge, %16, %69 : vector<96x1xi32>
    %cst_34 = arith.constant 0.000000e+00 : f32
    %71 = vector.shape_cast %70 : vector<96x1xi1> to vector<96x1xi1>
    %72 = vector.broadcast %71 : vector<96x1xi1> to vector<96x128xi1>
    %73 = vector.broadcast %cst_34 : f32 to vector<96x128xf32>
    %74 = arith.select %72, %68, %73 : vector<96x128xi1>, vector<96x128xf32>
    %75 = arith.truncf %74 : vector<96x128xf32> to vector<96x128xbf16>
    %c2_35 = arith.constant 2 : index
    %c0_36 = arith.constant 0 : index
    %c0_37 = arith.constant 0 : index
    %76 = vector.load %arg4[%c2_35, %c0_36, %c0_37] : memref<3x128x128xbf16, #tpu.memory_space<vmem>>, vector<1x128x128xbf16>
    %77 = vector.shape_cast %76 : vector<1x128x128xbf16> to vector<128x128xbf16>
    %cst_38 = arith.constant dense<0.000000e+00> : vector<96x128xf32>
    %78 = tpu.matmul %75, %77, %cst_38 {dimension_numbers = #tpu.dot_dimension_numbers<[1], [0], [0], [1], [0, 0, 1, 1], [], []>} : vector<96x128xbf16>, vector<128x128xbf16>, vector<96x128xf32> -> vector<96x128xf32>
    %79 = arith.addf %67, %78 : vector<96x128xf32>
    %c0_39 = arith.constant 0 : index
    %c0_40 = arith.constant 0 : index
    %80 = vector.load %arg5[%c0_39, %c0_40] : memref<1x128xf32, #tpu.memory_space<vmem>>, vector<1x128xf32>
    %81 = vector.broadcast %80 : vector<1x128xf32> to vector<96x128xf32>
    %82 = arith.addf %79, %81 : vector<96x128xf32>
    %cst_41 = arith.constant 0.000000e+00 : f32
    %83 = vector.broadcast %cst_41 : f32 to vector<96x128xf32>
    %84 = arith.maximumf %82, %83 : vector<96x128xf32>
    %85 = arith.truncf %84 : vector<96x128xf32> to vector<96x128xbf16>
    %c0_42 = arith.constant 0 : index
    %c0_43 = arith.constant 0 : index
    %c0_44 = arith.constant 0 : index
    %86 = vector.load %arg6[%c0_42, %c0_43, %c0_44] : memref<1x128x128xbf16, #tpu.memory_space<vmem>>, vector<1x128x128xbf16>
    %87 = vector.shape_cast %86 : vector<1x128x128xbf16> to vector<128x128xbf16>
    %cst_45 = arith.constant dense<0.000000e+00> : vector<96x128xf32>
    %88 = tpu.matmul %85, %87, %cst_45 {dimension_numbers = #tpu.dot_dimension_numbers<[1], [0], [0], [1], [0, 0, 1, 1], [], []>} : vector<96x128xbf16>, vector<128x128xbf16>, vector<96x128xf32> -> vector<96x128xf32>
    %c0_46 = arith.constant 0 : index
    %c0_47 = arith.constant 0 : index
    %89 = vector.load %arg7[%c0_46, %c0_47] : memref<1x128xf32, #tpu.memory_space<vmem>>, vector<1x128xf32>
    %90 = vector.broadcast %89 : vector<1x128xf32> to vector<96x128xf32>
    %91 = arith.addf %88, %90 : vector<96x128xf32>
    %92 = vector.shape_cast %91 : vector<96x128xf32> to vector<6x16x128xf32>
    %c0_48 = arith.constant 0 : index
    %c0_49 = arith.constant 0 : index
    %c0_50 = arith.constant 0 : index
    %93 = vector.load %arg8[%c0_48, %c0_49, %c0_50] : memref<6x16x128xf32, #tpu.memory_space<vmem>>, vector<6x16x128xf32>
    tpu.vector_store %arg8[%c0_48, %c0_49, %c0_50], %92 {strides = array<i32>} : memref<6x16x128xf32, #tpu.memory_space<vmem>>, vector<6x16x128xf32>,
    return
  }
  func.func @transform_0(%arg0: i32) -> (i32, i32, i32) {
    %c0_i32 = arith.constant 0 : i32
    %c0_i32_0 = arith.constant 0 : i32
    %c0_i32_1 = arith.constant 0 : i32
    return %arg0, %c0_i32, %c0_i32_0 : i32, i32, i32
  }
  func.func @transform_1(%arg0: i32) -> (i32, i32, i32) {
    %c0_i32 = arith.constant 0 : i32
    %c0_i32_0 = arith.constant 0 : i32
    %c0_i32_1 = arith.constant 0 : i32
    %c0_i32_2 = arith.constant 0 : i32
    return %c0_i32, %c0_i32_0, %c0_i32_1 : i32, i32, i32
  }
  func.func @transform_2(%arg0: i32) -> (i32, i32) {
    %c0_i32 = arith.constant 0 : i32
    %c0_i32_0 = arith.constant 0 : i32
    %c0_i32_1 = arith.constant 0 : i32
    return %c0_i32, %c0_i32_0 : i32, i32
  }
  func.func @transform_3(%arg0: i32) -> (i32, i32, i32) {
    %c0_i32 = arith.constant 0 : i32
    %c0_i32_0 = arith.constant 0 : i32
    %c0_i32_1 = arith.constant 0 : i32
    %c0_i32_2 = arith.constant 0 : i32
    return %c0_i32, %c0_i32_0, %c0_i32_1 : i32, i32, i32
  }
  func.func @transform_4(%arg0: i32) -> (i32, i32) {
    %c0_i32 = arith.constant 0 : i32
    %c0_i32_0 = arith.constant 0 : i32
    %c0_i32_1 = arith.constant 0 : i32
    return %c0_i32, %c0_i32_0 : i32, i32
  }
  func.func @transform_5(%arg0: i32) -> (i32, i32, i32) {
    %c0_i32 = arith.constant 0 : i32
    %c0_i32_0 = arith.constant 0 : i32
    %c0_i32_1 = arith.constant 0 : i32
    %c0_i32_2 = arith.constant 0 : i32
    return %c0_i32, %c0_i32_0, %c0_i32_1 : i32, i32, i32
  }
  func.func @transform_6(%arg0: i32) -> (i32, i32) {
    %c0_i32 = arith.constant 0 : i32
    %c0_i32_0 = arith.constant 0 : i32
    %c0_i32_1 = arith.constant 0 : i32
    return %c0_i32, %c0_i32_0 : i32, i32
  }
  func.func @transform_7(%arg0: i32) -> (i32, i32, i32) {
    %c0_i32 = arith.constant 0 : i32
    %c0_i32_0 = arith.constant 0 : i32
    %c0_i32_1 = arith.constant 0 : i32
    return %arg0, %c0_i32, %c0_i32_0 : i32, i32, i32
  }
}

</mosaic_0001>

<bundles_post_ra>
// kernel: tpu_custom_call.1
= control target key start
LH: loop header
LB: loop body
LE: loop exit
PB: predicated region body
PF: predicated region fallthrough
CT: control target
= control target key end

     0   :  { %12 = vsyncpa [#allocation3], 0  ;;  %s2611_s0 = inlined_call_operand.vmem [shape: f32[6,16,4], index: 0, kind: input, shape index: {}]   ;;  %s2612_s1 = inlined_call_operand.vmem [shape: bf16[3,4,128], index: 1, kind: input, shape index: {}]   ;;  %s2613_s2 = inlined_call_operand.vmem [shape: f32[1,128], index: 2, kind: input, shape index: {}]   ;;  %s2614_s3 = inlined_call_operand.hbm [shape: bf16[3,128,128], index: 3, kind: input, shape index: {}]   ;;  %s2615_s4 = inlined_call_operand.vmem [shape: f32[1,128], index: 4, kind: input, shape index: {}]   ;;  %s2616_s5 = inlined_call_operand.vmem [shape: bf16[1,128,128], index: 5, kind: input, shape index: {}]   ;;  %s2617_s6 = inlined_call_operand.vmem [shape: f32[1,128], index: 6, kind: input, shape index: {}]   ;;  %s2618_s7 = inlined_call_operand.hbm [shape: f32[6,16,128], index: 7, kind: output, shape index: {}]  }
   0x1   :  { %13 = vsyncpa [#allocation4], 0  ;;  %s1948_s24 = smov [#allocation2]   ;;  %s1900_s28 = scalar_lea.hbm %s2614_s3, 3072 }
   0x2   :  { %s25_s25 = sshll.u32 %s1948_s24, 4  ;;  %p1901_p0 = scmp.ne.s32.totalorder %s2614_s3, %s1900_s28  ;;  %s26_s25 = int_to_ptr.vmem [resolvable:$true] %s25_s25 }
   0x3   :  { %p1904_p1 = scmp.lt.u32.totalorder %s1900_s28, %s2614_s3 }
   0x5   :  { %p1906_p2 = pnand %p1904_p1, %p1901_p0 }
   0x7   :  { %1909 = shalt.err (!%p1906_p2)
}
   0x8   :  { %s1910_s10 = scalar_lea.vmem %s26_s25, 3072  ;;  %p1915_p4 = scmp.lt.s32.totalorder %s26_s25, %s26_s25 }
   0x9   :  { %p1911_p3 = scmp.ne.s32.totalorder %s26_s25, %s1910_s10  ;;  %p1916_p5 = scmp.lt.s32.totalorder %s1910_s10, %s1910_s10 }
   0xb   :  { %p1917_p6 = por %p1916_p5, %p1915_p4 }
   0xd   :  { %p1918_p7 = pnand %p1917_p6, %p1911_p3 }
   0xf   :  { %1921 = shalt.err (!%p1918_p7)
}
  0x10   :  { %s1949_s11 = smov 64   ;;  %s1950_s12 = smov 4  }
  0x11   :  { %31 = dma.hbm_to_vmem [thread:$0]  %s2614_s3, 3072, %s26_s25, [#allocation3], %s1949_s11, %s1949_s11, %s1950_s12  }
  0x12   :  { %1944 = dma.done.wait [#allocation3], 3072  }
  0x13   :  { %1945 = vsyncadd [#allocation3], 4294964224  ;;  %v42_v0 = vlaneseq  ;;  %vm318_vm0 = vcmask 1041408   ;;  %v1488_v5 = vld [vmem:[%s2612_s1 + $0x2] sm:$0x3]  ;;  %v2025_v7 = vld [vmem:[%s2611_s0 + $0x8] sm:$0xff] }
  0x14   :  { %v2020_v6 = vld [vmem:[%s2611_s0] sm:$0xff]  ;;  %1858 = vmatprep.subr.msk.bf16.mxu0 %vm318_vm0, %v1488_v5  ;;  %v320_v9 = vsel %vm318_vm0, %v1488_v5, 0  ;;  %v2036_v10 = vld [vmem:[%s2611_s0 + $0x58] sm:$0xff]  ;;  %v219_v12 = vrot.slane %v2025_v7, 6  ;;  %v2043_v13 = vld [vmem:[%s2611_s0 + $0x10] sm:$0xff]  ;;  %vm299_vm3 = vcmask 31744  }
  0x15   :  { %v2007_v1 = vshrl.u32 %v42_v0, 7  ;;  %v218_v11 = vrot.slane %v2020_v6, 6  ;;  %1657 = vmatpush3.bf16.msra.mxu0 %v320_v9  ;;  %v229_v15 = vrot.slane %v2036_v10, 6  ;;  %v217_v17 = vld [vmem:[%s2612_s1] sm:$0x3]  ;;  %v2061_v18 = vld [vmem:[%s2611_s0 + $0x18] sm:$0xff] }
  0x16   :  { %1859 = vmatprep.subr.msk.bf16.mxu0 %vm318_vm0, %v217_v17  ;;  %v220_v20 = vrot.slane %v2043_v13, 6  ;;  %v221_v21 = vrot.slane %v2061_v18, 6  ;;  %v2082_v25 = vld [vmem:[%s2611_s0 + $0x20] sm:$0xff]  ;;  %v2087_v26 = vld [vmem:[%s2611_s0 + $0x28] sm:$0xff]  ;;  %v2092_v27 = vld [vmem:[%s2611_s0 + $0x30] sm:$0xff]  ;;  %v422_v39 = vsel %vm318_vm0, %v217_v17, 0 }
  0x17   :  { %v2010_v2 = vadd.s32 16, %v2007_v1  ;;  %v59_v3 = vand.u32 15, %v2007_v1  ;;  %vm230_vm1 = vcmp.lt.s32.totalorder %v2007_v1, 2  ;;  %v2029_v8 = vadd.s32 32, %v2007_v1  ;;  %v2110_v34 = vld [vmem:[%s2611_s0 + $0x38] sm:$0xff]  ;;  %v2115_v35 = vld [vmem:[%s2611_s0 + $0x40] sm:$0xff] }
  0x18   :  { %v2046_v14 = vadd.s32 48, %v2007_v1  ;;  %v241_v19 = vsel %vm230_vm1, %v218_v11, %v219_v12  ;;  %v242_v23 = vsel %vm230_vm1, %v229_v15, %v218_v11  ;;  %v2095_v28 = vadd.s32 64, %v2007_v1  ;;  %v1868_v36 = vld [vmem:[#allocation2 + $0x40] sm:$0xff]   ;;  %v2123_v40 = vld [vmem:[%s2611_s0 + $0x48] sm:$0xff]  ;;  %v2142_v48 = vld [vmem:[%s2611_s0 + $0x50] sm:$0xff] }
  0x19   :  { %v73_v4 = vand.u32 15, %v2010_v2  ;;  %vm2051_vm2 = vcmp.ge.s32.totalorder %v59_v3, 2  ;;  %v87_v24 = vand.u32 15, %v2029_v8  ;;  %v2098_v29 = vadd.s32 80, %v2007_v1  ;;  %v1501_v44 = vld [vmem:[%s2612_s1 + $0x4] sm:$0x3]  ;;  %1698 = vmatprep.subr.bf16.mxu1 %v1868_v36 }
  0x1a   :  { %v279_v30 = vsel %vm2051_vm2, %v242_v23, 0.0  ;;  %v239_v31 = vsel %vm230_vm1, %v220_v20, %v221_v21  ;;  %v240_v32 = vsel %vm230_vm1, %v219_v12, %v220_v20  ;;  %v101_v33 = vand.u32 15, %v2046_v14  ;;  %1699 = vmatpush3.bf16.msra.mxu1 %v1868_v36  ;;  %v1881_v51 = vld [vmem:[#allocation2 + $0x28] sm:$0xff]   ;;  %v1882_v60 = vld [vmem:[#allocation2 + $0x30] sm:$0xff]  }
  0x1b   :  { %vm2070_vm4 = vcmp.ge.s32.totalorder %v73_v4, 2  ;;  %v291_v37 = vpack.c.bf16 %v241_v19, %v279_v30  ;;  %v222_v42 = vrot.slane %v2082_v25, 6  ;;  %v223_v43 = vrot.slane %v2087_v26, 6  ;;  %v1885_v17 = vld [vmem:[#allocation2 + $0x88] sm:$0xff]  }
  0x1c   :  { %v281_v38 = vsel %vm2070_vm4, %v240_v32, 0.0  ;;  %vm2133_vm5 = vcmp.ge.s32.totalorder %v87_v24, 2  ;;  %v224_v46 = vrot.slane %v2092_v27, 6  ;;  %v225_v47 = vrot.slane %v2110_v34, 6 }
  0x1d   :  { %v292_v41 = vpack.c.bf16 %v239_v31, %v281_v38  ;;  %1658 = vmatprep.mubr.msk.bf16.mxu0 %vm299_vm3, %v291_v37  ;;  %v237_v49 = vsel %vm230_vm1, %v222_v42, %v223_v43  ;;  %v238_v50 = vsel %vm230_vm1, %v221_v21, %v222_v42  ;;  %vm2151_vm6 = vcmp.ge.s32.totalorder %v101_v33, 2 }
  0x1e   :  { %v115_v52 = vand.u32 15, %v2095_v28  ;;  %v283_v53 = vsel %vm2133_vm5, %v238_v50, 0.0  ;;  %v235_v54 = vsel %vm230_vm1, %v224_v46, %v225_v47  ;;  %v236_v55 = vsel %vm230_vm1, %v223_v43, %v224_v46 }
  0x1f   :  { %1659 = vmatmul.mubr.msk.bf16.vlgmr.msra.gmra.mrb[0].mxu0 %vm299_vm3, %v292_v41  ;;  %v226_v56 = vrot.slane %v2115_v35, 6  ;;  %v293_v57 = vpack.c.bf16 %v237_v49, %v283_v53  ;;  %v285_v58 = vsel %vm2151_vm6, %v236_v55, 0.0  ;;  %v227_v59 = vrot.slane %v2123_v40, 6 }
  0x20   :  { %1671 = vmatpush3.bf16.msra.mxu0 %v422_v39  ;;  %vm2168_vm7 = vcmp.ge.s32.totalorder %v115_v52, 2  ;;  %v129_v62 = vand.u32 15, %v2098_v29  ;;  %v228_v63 = vrot.slane %v2142_v48, 6  ;;  %v294_v0 = vpack.c.bf16 %v235_v54, %v285_v58  ;;  %v1870_v29 = vld [vmem:[#allocation2 + $0x50] sm:$0xff]  }
  0x21   :  { %1860 = vmatprep.subr.msk.bf16.mxu0 %vm318_vm0, %v1501_v44  ;;  %v234_v61 = vsel %vm230_vm1, %v225_v47, %v226_v56  ;;  %1662 = vmatprep.mubr.msk.bf16.mxu0 %vm299_vm3, %v293_v57  ;;  %v233_v5 = vsel %vm230_vm1, %v226_v56, %v227_v59  ;;  %v211_v23 = vpack.c.bf16 %v2025_v7, %v2020_v6  ;;  %v605_v30 = vsel %vm318_vm0, %v1501_v44, 0  ;;  %v1569_v57 = vld [vmem:[%s2615_s4] ss:$0 sm:$0xff] }
  0x22   :  { %v287_v9 = vsel %vm2168_vm7, %v234_v61, 0.0  ;;  %v232_v12 = vsel %vm230_vm1, %v227_v59, %v228_v63  ;;  %vm2186_vm8 = vcmp.ge.s32.totalorder %v129_v62, 2  ;;  %v231_v19 = vsel %vm230_vm1, %v228_v63, %v229_v15 }
  0x23   :  { %v295_v11 = vpack.c.bf16 %v233_v5, %v287_v9  ;;  %v289_v20 = vsel %vm2186_vm8, %v232_v12, 0.0  ;;  %v212_v31 = vpack.c.bf16 %v2061_v18, %v2043_v13  ;;  %v213_v32 = vpack.c.bf16 %v2087_v26, %v2082_v25  ;;  %v1869_v9 = vld [vmem:[#allocation2 + $0x48] sm:$0xff]  }
  0x24   :  { %v296_v21 = vpack.c.bf16 %v231_v19, %v289_v20  ;;  %v505_v15 = vrot.slane %v2020_v6, 4  ;;  %v516_v36 = vrot.slane %v2036_v10, 4  ;;  %vm517_vm9 = vcmp.lt.s32.totalorder %v2007_v1, 4  ;;  %1700 = vmatprep.subr.bf16.mxu1 %v1869_v9  ;;  %v1873_v12 = vld [vmem:[#allocation2 + $0x68] sm:$0xff]   ;;  %v1874_v19 = vld [vmem:[#allocation2 + $0x70] sm:$0xff]   ;;  %v1875_v20 = vld [vmem:[#allocation2 + $0x78] sm:$0xff]  }
  0x25   :  { %v214_v37 = vpack.c.bf16 %v2110_v34, %v2092_v27  ;;  %v215_v38 = vpack.c.bf16 %v2123_v40, %v2115_v35  ;;  %v506_v39 = vrot.slane %v2025_v7, 4  ;;  %vm2219_vm10 = vcmp.ge.s32.totalorder %v59_v3, 4  ;;  %1701 = vmatpush3.bf16.msra.mxu1 %v1869_v9  ;;  %v1879_v1 = vld [vmem:[#allocation2 + $0x18] sm:$0xff]  }
  0x26   :  { %v529_v6 = vsel %vm517_vm9, %v516_v36, %v505_v15  ;;  %v507_v42 = vrot.slane %v2043_v13, 4  ;;  %v509_v3 = vrot.slane %v2082_v25, 4  ;;  %v216_v44 = vpack.c.bf16 %v2036_v10, %v2142_v48  ;;  %1702 = vmatprep.subr.bf16.mxu1 %v1870_v29  ;;  %v1898_v13 = vld [vmem:[%s2616_s5 + $0x30] sm:$0xff]   ;;  %v1899_v10 = vld [vmem:[%s2616_s5 + $0x38] sm:$0xff]  }
  0x27   :  { %1663 = vmatmul.mubr.msk.bf16.gmra.mrb[4].mxu0 %vm299_vm3, %v294_v0  ;;  %v528_v43 = vsel %vm517_vm9, %v505_v15, %v506_v39  ;;  %v566_v7 = vsel %vm2219_vm10, %v529_v6, 0.0  ;;  %v508_v46 = vrot.slane %v2061_v18, 4  ;;  %vm2240_vm11 = vcmp.ge.s32.totalorder %v73_v4, 4  ;;  %v1896_v15 = vld [vmem:[%s2616_s5 + $0x20] sm:$0xff]  }
  0x28   :  { %1666 = vmatprep.mubr.msk.bf16.mxu0 %vm299_vm3, %v295_v11  ;;  %v578_v47 = vpack.c.bf16 %v528_v43, %v566_v7  ;;  %v527_v49 = vsel %vm517_vm9, %v506_v39, %v507_v42  ;;  %v510_v50 = vrot.slane %v2087_v26, 4  ;;  %vm2249_vm12 = vcmp.ge.s32.totalorder %v87_v24, 4  ;;  %v1872_v11 = vld [vmem:[#allocation2 + $0x60] sm:$0xff]  }
  0x29   :  { %v525_v25 = vsel %vm517_vm9, %v508_v46, %v509_v3  ;;  %v526_v2 = vsel %vm517_vm9, %v507_v42, %v508_v46  ;;  %v568_v4 = vsel %vm2240_vm11, %v527_v49, 0.0  ;;  %v511_v24 = vrot.slane %v2092_v27, 4  ;;  %1703 = vmatpush3.bf16.msra.mxu1 %v1870_v29 }
  0x2a   :  { %v524_v18 = vsel %vm517_vm9, %v509_v3, %v510_v50  ;;  %v570_v8 = vsel %vm2249_vm12, %v525_v25, 0.0  ;;  %v513_v26 = vrot.slane %v2115_v35, 4  ;;  %v579_v53 = vpack.c.bf16 %v526_v2, %v568_v4 }
  0x2b   :  { %v580_v54 = vpack.c.bf16 %v524_v18, %v570_v8  ;;  %v512_v55 = vrot.slane %v2110_v34, 4  ;;  %v523_v56 = vsel %vm517_vm9, %v510_v50, %v511_v24  ;;  %vm2270_vm13 = vcmp.ge.s32.totalorder %v101_v33, 4 }
  0x2c   :  { %v514_v58 = vrot.slane %v2123_v40, 4  ;;  %vm2279_vm14 = vcmp.ge.s32.totalorder %v115_v52, 4  ;;  %v572_v33 = vsel %vm2270_vm13, %v523_v56, 0.0  ;;  %v515_v40 = vrot.slane %v2142_v48, 4 }
  0x2d   :  { %v521_v27 = vsel %vm517_vm9, %v512_v55, %v513_v26  ;;  %v522_v14 = vsel %vm517_vm9, %v511_v24, %v512_v55  ;;  %vm2298_vm15 = vcmp.ge.s32.totalorder %v129_v62, 4  ;;  %v2642_v63 = vmov 0  ;;  %v1871_v62 = vld [vmem:[#allocation2 + $0x58] sm:$0xff]  }
  0x2e   :  { %v520_v34 = vsel %vm517_vm9, %v513_v26, %v514_v58  ;;  %v574_v28 = vsel %vm2279_vm14, %v521_v27, 0.0  ;;  %v581_v52 = vpack.c.bf16 %v522_v14, %v572_v33  ;;  %v519_v61 = vsel %vm517_vm9, %v514_v58, %v515_v40  ;;  %1704 = vmatprep.subr.bf16.mxu1 %v1871_v62 }
  0x2f   :  { %1667 = vmatmul.mubr.msk.bf16.gmra.mrb[8].mxu0 %vm299_vm3, %v296_v21  ;;  %v582_v59 = vpack.c.bf16 %v520_v34, %v574_v28  ;;  %v2643_v63 = vsel %vm2298_vm15, 4294967295, %v2642_v63  ;;  %v518_v0 = vsel %vm517_vm9, %v515_v40, %v516_v36  ;;  %v576_v48 = vsel %vm2298_vm15, %v519_v61, 0.0  ;;  %1705 = vmatpush3.bf16.msra.mxu1 %v1871_v62  ;;  %v2309_v21 = vld [vmem:[#allocation2] sm:$0xff]   ;;  %v1897_v36 = vld [vmem:[%s2616_s5 + $0x28] sm:$0xff]  }
  0x30   :  { %1672 = vmatprep.mubr.msk.bf16.mxu0 %vm299_vm3, %v211_v23  ;;  %v583_v5 = vpack.c.bf16 %v518_v0, %v576_v48  ;;  %1706 = vmatprep.subr.bf16.mxu1 %v1872_v11  ;;  %v1892_v23 = vld [vmem:[%s2616_s5] sm:$0xff]   ;;  %vm1951_vm0 = vmmov 1  }
  0x31   :  { %vm1520_vm15 = vmpackc.low %vm1951_vm0, %vm2070_vm4 }
  0x32   :  { %vm1529_vm4 = vmpackc.low %vm1951_vm0, %vm2168_vm7 }
  0x33   :  { %1707 = vmatpush3.bf16.msra.mxu1 %v1872_v11  ;;  %vm1554_vm7 = vmpackc.low %vm1951_vm0, %vm2240_vm11  ;;  %vm2645_vm11 = vnez %v2643_v63 }
  0x34   :  { %1708 = vmatprep.subr.bf16.mxu1 %v1873_v12 }
  0x37   :  { %1673 = vmatmul.mubr.msk.bf16.vlgmr.msra.gmra.mrb[0].mxu0 %vm299_vm3, %v212_v31  ;;  %1709 = vmatpush3.bf16.msra.mxu1 %v1873_v12  ;;  %v1894_v31 = vld [vmem:[%s2616_s5 + $0x10] sm:$0xff]  }
  0x38   :  { %1685 = vmatpush3.bf16.msra.mxu0 %v605_v30  ;;  %1676 = vmatprep.mubr.msk.bf16.mxu0 %vm299_vm3, %v213_v32  ;;  %v1893_v30 = vld [vmem:[%s2616_s5 + $0x8] sm:$0xff]   ;;  %v1895_v32 = vld [vmem:[%s2616_s5 + $0x18] sm:$0xff]  }
  0x39   :  { %1710 = vmatprep.subr.bf16.mxu1 %v1874_v19  ;;  %1782 = vmatprep.subr.bf16.mxu0 %v1892_v23 }
  0x3b   :  { %1711 = vmatpush3.bf16.msra.mxu1 %v1874_v19 }
  0x3c   :  { %1712 = vmatprep.subr.bf16.mxu1 %v1875_v20 }
  0x3f   :  { %1677 = vmatmul.mubr.msk.bf16.gmra.mrb[4].mxu0 %vm299_vm3, %v214_v37  ;;  %1713 = vmatpush3.bf16.msra.mxu1 %v1875_v20  ;;  %v2333_v37 = vld [vmem:[%s2613_s2] ss:$0 sm:$0xff] }
  0x40   :  { %1680 = vmatprep.mubr.msk.bf16.mxu0 %vm299_vm3, %v215_v38  ;;  %1726 = vmatprep.subr.bf16.mxu1 %v2309_v21 }
  0x47   :  { %1681 = vmatmul.mubr.msk.bf16.gmra.mrb[8].mxu0 %vm299_vm3, %v216_v44 }
  0x48   :  { %1686 = vmatprep.mubr.msk.bf16.mxu0 %vm299_vm3, %v578_v47 }
  0x4f   :  { %1687 = vmatmul.mubr.msk.bf16.vlgmr.msra.gmra.mrb[0].mxu0 %vm299_vm3, %v579_v53 }
  0x50   :  { %1690 = vmatprep.mubr.msk.bf16.mxu0 %vm299_vm3, %v580_v54  ;;  %1783 = vmatpush3.bf16.msra.mxu0 %v1892_v23 }
  0x51   :  { %1784 = vmatprep.subr.bf16.mxu0 %v1893_v30 }
  0x54   :  { %1785 = vmatpush3.bf16.msra.mxu0 %v1893_v30 }
  0x55   :  { %1786 = vmatprep.subr.bf16.mxu0 %v1894_v31 }
  0x57   :  { %1691 = vmatmul.mubr.msk.bf16.gmra.mrb[4].mxu0 %vm299_vm3, %v581_v52 }
  0x58   :  { %1694 = vmatprep.mubr.msk.bf16.mxu0 %vm299_vm3, %v582_v59  ;;  %1787 = vmatpush3.bf16.msra.mxu0 %v1894_v31 }
  0x59   :  { %1788 = vmatprep.subr.bf16.mxu0 %v1895_v32 }
  0x5c   :  { %1789 = vmatpush3.bf16.msra.mxu0 %v1895_v32 }
  0x5d   :  { %1790 = vmatprep.subr.bf16.mxu0 %v1896_v15 }
  0x5f   :  { %1695 = vmatmul.mubr.msk.bf16.gmra.mrb[8].mxu0 %vm299_vm3, %v583_v5  ;;  %vm1517_vm3 = vmpackc.low %vm1951_vm0, %vm2051_vm2 }
  0x60   :  { %1791 = vmatpush3.bf16.msra.mxu0 %v1896_v15  ;;  %vm1523_vm2 = vmpackc.low %vm1951_vm0, %vm2133_vm5 }
  0x61   :  { %1792 = vmatprep.subr.bf16.mxu0 %v1897_v36  ;;  %vm1532_vm5 = vmpackc.low %vm1951_vm0, %vm2186_vm8 }
  0x62   :  { %vm1557_vm8 = vmpackc.low %vm1951_vm0, %vm2249_vm12 }
  0x63   :  { %vm1566_vm12 = vmpackc.low %vm1951_vm0, %vm2645_vm11 }
  0x64   :  { %1793 = vmatpush3.bf16.msra.mxu0 %v1897_v36 }
  0x65   :  { %1794 = vmatprep.subr.bf16.mxu0 %v1898_v13 }
  0x68   :  { %1795 = vmatpush3.bf16.msra.mxu0 %v1898_v13 }
  0x69   :  { %1796 = vmatprep.subr.bf16.mxu0 %v1899_v10 }
  0x6c   :  { %1797 = vmatpush3.bf16.msra.mxu0 %v1899_v10 }
 0x122   :  { %v1688_v38 = vpop.f32.mrb[0].mxu0 }
 0x123   :  { %v709_v39 = vadd.f32 %v1688_v38, %v2333_v37  ;;  %v641_v6 = vpop.f32.mrb[1].mxu0 }
 0x124   :  { %v707_v42 = vadd.f32 %v2333_v37, %v641_v6  ;;  %v1689_v43 = vpop.f32.mrb[2].mxu0 }
 0x125   :  { %v2337_v7 = vmax.f32 %v709_v39, 0.0  ;;  %v710_v3 = vadd.f32 %v1689_v43, %v2333_v37  ;;  %v644_v44 = vpop.f32.mrb[3].mxu0 }
 0x126   :  { %v2340_v46 = vmax.f32 %v707_v42, 0.0  ;;  %v708_v47 = vadd.f32 %v2333_v37, %v644_v44 }
 0x127   :  { %v2343_v49 = vmax.f32 %v710_v3, 0.0  ;;  %v755_v50 = vrot.slane %v2337_v7, 6  ;;  %v1072_v2 = vrot.slane %v2337_v7, 4 }
 0x128   :  { %v2346_v25 = vmax.f32 %v708_v47, 0.0  ;;  %v753_v24 = vrot.slane %v2340_v46, 6  ;;  %v1070_v56 = vrot.slane %v2340_v46, 4 }
 0x129   :  { %v732_v4 = vpack.c.bf16 %v2343_v49, %v2337_v7  ;;  %v756_v18 = vrot.slane %v2343_v49, 6  ;;  %v1073_v8 = vrot.slane %v2343_v49, 4  ;;  %v1888_v7 = vld [vmem:[#allocation2 + $0xa0] sm:$0xff]   ;;  %v1889_v49 = vld [vmem:[#allocation2 + $0xa8] sm:$0xff]  }
 0x12a   :  { %v754_v26 = vrot.slane %v2346_v25, 6  ;;  %v1071_v53 = vrot.slane %v2346_v25, 4  ;;  %v1692_v54 = vpop.f32.mrb[4].mxu0  ;;  %v731_v55 = vpack.c.bf16 %v2346_v25, %v2340_v46  ;;  %v1886_v46 = vld [vmem:[#allocation2 + $0x90] sm:$0xff]   ;;  %v1887_v25 = vld [vmem:[#allocation2 + $0x98] sm:$0xff]  }
 0x12b   :  { %v2361_v58 = vsel %vm517_vm9, %v1072_v2, %v1073_v8  ;;  %v713_v27 = vadd.f32 %v1692_v54, %v2333_v37  ;;  %v657_v14 = vpop.f32.mrb[5].mxu0  ;;  %v2366_v33 = vsel %vm230_vm1, %v755_v50, %v756_v18 }
 0x12c   :  { %v2370_v34 = vsel %vm517_vm9, %v1071_v53, %v1072_v2  ;;  %v711_v28 = vadd.f32 %v2333_v37, %v657_v14  ;;  %v1693_v40 = vpop.f32.mrb[6].mxu0  ;;  %v2377_v52 = vsel %vm230_vm1, %v753_v24, %v754_v26  ;;  %v2381_v59 = vsel %vm230_vm1, %v754_v26, %v755_v50 }
 0x12d   :  { %v1555_v61 = vpack.c.bf16 %v2361_v58, %v2370_v34  ;;  %v2385_v0 = vmax.f32 %v713_v27, 0.0  ;;  %v714_v48 = vadd.f32 %v1693_v40, %v2333_v37  ;;  %v660_v5 = vpop.f32.mrb[7].mxu0  ;;  %v1521_v9 = vpack.c.bf16 %v2366_v33, %v2381_v59  ;;  %v1880_v33 = vld [vmem:[#allocation2 + $0x20] sm:$0xff]  }
 0x12e   :  { %v2390_v29 = vmax.f32 %v711_v28, 0.0  ;;  %v712_v62 = vadd.f32 %v2333_v37, %v660_v5  ;;  %v2397_v11 = vsel %vm517_vm9, %v1070_v56, %v1071_v53  ;;  %v1884_v59 = vld [vmem:[#allocation2 + $0x80] sm:$0xff]  }
 0x12f   :  { %v2399_v12 = vmax.f32 %v714_v48, 0.0  ;;  %v759_v19 = vrot.slane %v2385_v0, 6  ;;  %v1076_v31 = vrot.slane %v2385_v0, 4 }
 0x130   :  { %v757_v20 = vrot.slane %v2390_v29, 6  ;;  %v1074_v23 = vrot.slane %v2390_v29, 4  ;;  %v2404_v30 = vmax.f32 %v712_v62, 0.0 }
 0x131   :  { %v760_v32 = vrot.slane %v2399_v12, 6  ;;  %v1077_v15 = vrot.slane %v2399_v12, 4  ;;  %v734_v36 = vpack.c.bf16 %v2399_v12, %v2385_v0 }
 0x132   :  { %v758_v38 = vrot.slane %v2404_v30, 6  ;;  %v1075_v39 = vrot.slane %v2404_v30, 4  ;;  %v1696_v6 = vpop.f32.mrb[8].mxu0  ;;  %v772_v42 = vsel %vm230_vm1, %v756_v18, %v757_v20  ;;  %v733_v43 = vpack.c.bf16 %v2404_v30, %v2390_v29 }
 0x133   :  { %v717_v3 = vadd.f32 %v1696_v6, %v2333_v37  ;;  %v673_v44 = vpop.f32.mrb[9].mxu0  ;;  %v2420_v47 = vsel %vm230_vm1, %v759_v19, %v760_v32  ;;  %v2424_v50 = vsel %vm517_vm9, %v1073_v8, %v1074_v23  ;;  %v2428_v2 = vsel %vm517_vm9, %v1076_v31, %v1077_v15 }
 0x134   :  { %v715_v18 = vadd.f32 %v2333_v37, %v673_v44  ;;  %v1697_v26 = vpop.f32.mrb[10].mxu0  ;;  %v771_v53 = vsel %vm230_vm1, %v757_v20, %v758_v38  ;;  %v770_v54 = vsel %vm230_vm1, %v758_v38, %v759_v19  ;;  %v2437_v27 = vsel %vm517_vm9, %v1074_v23, %v1075_v39 }
 0x135   :  { %v2439_v14 = vmax.f32 %v717_v3, 0.0  ;;  %v718_v8 = vadd.f32 %v1697_v26, %v2333_v37  ;;  %v676_v28 = vpop.f32.mrb[11].mxu0  ;;  %v1524_v40 = vpack.c.bf16 %v771_v53, %v772_v42  ;;  %v1527_v48 = vpack.c.bf16 %v2420_v47, %v770_v54 }
 0x136   :  { %v2443_v5 = vmax.f32 %v715_v18, 0.0  ;;  %v716_v62 = vadd.f32 %v2333_v37, %v676_v28  ;;  %v1558_v20 = vpack.c.bf16 %v2437_v27, %v2424_v50  ;;  %v2450_v19 = vsel %vm517_vm9, %v1075_v39, %v1076_v31 }
 0x137   :  { %v2452_v23 = vmax.f32 %v718_v8, 0.0  ;;  %v763_v6 = vrot.slane %v2439_v14, 6  ;;  %v1080_v37 = vrot.slane %v2439_v14, 4  ;;  %v2644_v41 = vpack.c.bf16 %v2428_v2, %v2450_v19 }
 0x138   :  { %v761_v42 = vrot.slane %v2443_v5, 6  ;;  %v1078_v3 = vrot.slane %v2443_v5, 4  ;;  %v2459_v44 = vmax.f32 %v716_v62, 0.0 }
 0x139   :  { %v764_v47 = vrot.slane %v2452_v23, 6  ;;  %v1081_v31 = vrot.slane %v2452_v23, 4  ;;  %v736_v39 = vpack.c.bf16 %v2452_v23, %v2439_v14 }
 0x13a   :  { %v762_v18 = vrot.slane %v2459_v44, 6  ;;  %v1079_v26 = vrot.slane %v2459_v44, 4  ;;  %v768_v53 = vsel %vm230_vm1, %v760_v32, %v761_v42  ;;  %v735_v54 = vpack.c.bf16 %v2459_v44, %v2443_v5 }
 0x13b   :  { %v776_v8 = vsel %vm230_vm1, %v764_v47, %v753_v24  ;;  %v765_v28 = vsel %vm230_vm1, %v763_v6, %v764_v47  ;;  %v2485_v32 = vsel %vm517_vm9, %v1081_v31, %v1070_v56  ;;  %v2489_v62 = vsel %vm517_vm9, %v1077_v15, %v1078_v3  ;;  %v1877_v15 = vld [vmem:[#allocation2 + $0x8] sm:$0xff]  }
 0x13c   :  { %v1518_v24 = vpack.c.bf16 %v2377_v52, %v776_v8  ;;  %v767_v16 = vsel %vm230_vm1, %v761_v42, %v762_v18  ;;  %v766_v47 = vsel %vm230_vm1, %v762_v18, %v763_v6  ;;  %v1552_v56 = vpack.c.bf16 %v2397_v11, %v2485_v32  ;;  %vm1526_vm1 = vmpackc.low %vm1951_vm0, %vm2151_vm6 }
 0x13d   :  { %v1530_v38 = vpack.c.bf16 %v767_v16, %v768_v53  ;;  %v1533_v52 = vpack.c.bf16 %v765_v28, %v766_v47  ;;  %v2506_v22 = vsel %vm517_vm9, %v1078_v3, %v1079_v26  ;;  %v2510_v42 = vsel %vm517_vm9, %v1080_v37, %v1081_v31  ;;  %v1878_v31 = vld [vmem:[#allocation2 + $0x10] sm:$0xff]   ;;  %vm1551_vm6 = vmpackc.low %vm1951_vm0, %vm2219_vm10 }
 0x13e   :  { %1714 = vmatprep.mubr.msk.bf16.mxu1 %vm1517_vm3, %v1518_v24  ;;  %v1564_v6 = vpack.c.bf16 %v2506_v22, %v2489_v62  ;;  %v2516_v45 = vsel %vm517_vm9, %v1079_v26, %v1080_v37  ;;  %vm1560_vm9 = vmpackc.low %vm1951_vm0, %vm2270_vm13 }
 0x13f   :  { %1715 = vmatmul.mubr.msk.bf16.vlgmr.msra.gmra.mrb[0].mxu1 %vm1520_vm15, %v1521_v9  ;;  %v1567_v3 = vpack.c.bf16 %v2510_v42, %v2516_v45  ;;  %vm1563_vm10 = vmpackc.low %vm1951_vm0, %vm2279_vm14  ;;  %v1570_v42 = vld [vmem:[%s2617_s6] ss:$0 sm:$0xff]  ;;  %s1952_s6 = smov [#allocation5]  }
 0x140   :  { %1727 = vmatpush3.bf16.msra.mxu1 %v2309_v21  ;;  %1718 = vmatprep.mubr.msk.bf16.mxu1 %vm1523_vm2, %v1524_v40  ;;  %v1883_v21 = vld [vmem:[#allocation2 + $0x38] sm:$0xff]   ;;  %s1476_s14 = sshll.u32 %s1952_s6, 4  ;;  %s1477_s14 = int_to_ptr.vmem [resolvable:$true] %s1476_s14 }
 0x141   :  { %1728 = vmatprep.subr.bf16.mxu1 %v1877_v15  ;;  %s1922_s15 = scalar_lea.vmem %s1477_s14, 1536  ;;  %p1927_p9 = scmp.lt.s32.totalorder %s1477_s14, %s1477_s14 }
 0x142   :  { %p1923_p8 = scmp.ne.s32.totalorder %s1477_s14, %s1922_s15  ;;  %p1928_p10 = scmp.lt.s32.totalorder %s1922_s15, %s1922_s15 }
 0x144   :  { %1729 = vmatpush3.bf16.msra.mxu1 %v1877_v15  ;;  %p1929_p11 = por %p1928_p10, %p1927_p9 }
 0x145   :  { %1730 = vmatprep.subr.bf16.mxu1 %v1878_v31 }
 0x146   :  { %p1930_p12 = pnand %p1929_p11, %p1923_p8 }
 0x147   :  { %1719 = vmatmul.mubr.msk.bf16.gmra.mrb[4].mxu1 %vm1526_vm1, %v1527_v48 }
 0x148   :  { %1731 = vmatpush3.bf16.msra.mxu1 %v1878_v31  ;;  %1722 = vmatprep.mubr.msk.bf16.mxu1 %vm1529_vm4, %v1530_v38 }
 0x149   :  { %1732 = vmatprep.subr.bf16.mxu1 %v1879_v1 }
 0x14c   :  { %1733 = vmatpush3.bf16.msra.mxu1 %v1879_v1 }
 0x14d   :  { %1734 = vmatprep.subr.bf16.mxu1 %v1880_v33 }
 0x14f   :  { %1723 = vmatmul.mubr.msk.bf16.gmra.mrb[8].mxu1 %vm1532_vm5, %v1533_v52 }
 0x150   :  { %1735 = vmatpush3.bf16.msra.mxu1 %v1880_v33  ;;  %1742 = vmatprep.mubr.bf16.mxu1 %v731_v55  ;;  %v1891_v55 = vld [vmem:[#allocation2 + $0xb8] sm:$0xff]  }
 0x151   :  { %1736 = vmatprep.subr.bf16.mxu1 %v1881_v51 }
 0x154   :  { %1737 = vmatpush3.bf16.msra.mxu1 %v1881_v51 }
 0x155   :  { %1738 = vmatprep.subr.bf16.mxu1 %v1882_v60 }
 0x158   :  { %1739 = vmatpush3.bf16.msra.mxu1 %v1882_v60 }
 0x159   :  { %1740 = vmatprep.subr.bf16.mxu1 %v1883_v21 }
 0x15c   :  { %1741 = vmatpush3.bf16.msra.mxu1 %v1883_v21 }
 0x15d   :  { %1754 = vmatprep.subr.bf16.mxu1 %v1884_v59 }
 0x15f   :  { %1743 = vmatmul.mubr.bf16.vlgmr.msra.gmra.mrb[0].mxu1 %v732_v4  ;;  %v1890_v4 = vld [vmem:[#allocation2 + $0xb0] sm:$0xff]  }
 0x160   :  { %1746 = vmatprep.mubr.bf16.mxu1 %v733_v43  ;;  %1755 = vmatpush3.bf16.msra.mxu1 %v1884_v59 }
 0x161   :  { %1756 = vmatprep.subr.bf16.mxu1 %v1885_v17 }
 0x164   :  { %1757 = vmatpush3.bf16.msra.mxu1 %v1885_v17 }
 0x165   :  { %1758 = vmatprep.subr.bf16.mxu1 %v1886_v46 }
 0x167   :  { %1747 = vmatmul.mubr.bf16.gmra.mrb[4].mxu1 %v734_v36 }
 0x168   :  { %1750 = vmatprep.mubr.bf16.mxu1 %v735_v54  ;;  %1759 = vmatpush3.bf16.msra.mxu1 %v1886_v46 }
 0x169   :  { %1760 = vmatprep.subr.bf16.mxu1 %v1887_v25 }
 0x16c   :  { %1761 = vmatpush3.bf16.msra.mxu1 %v1887_v25 }
 0x16d   :  { %1762 = vmatprep.subr.bf16.mxu1 %v1888_v7 }
 0x16f   :  { %1751 = vmatmul.mubr.bf16.gmra.mrb[8].mxu1 %v736_v39 }
 0x170   :  { %1763 = vmatpush3.bf16.msra.mxu1 %v1888_v7  ;;  %1770 = vmatprep.mubr.msk.bf16.mxu1 %vm1551_vm6, %v1552_v56 }
 0x171   :  { %1764 = vmatprep.subr.bf16.mxu1 %v1889_v49 }
 0x174   :  { %1765 = vmatpush3.bf16.msra.mxu1 %v1889_v49 }
 0x175   :  { %1766 = vmatprep.subr.bf16.mxu1 %v1890_v4 }
 0x178   :  { %1767 = vmatpush3.bf16.msra.mxu1 %v1890_v4 }
 0x179   :  { %1768 = vmatprep.subr.bf16.mxu1 %v1891_v55 }
 0x17c   :  { %1769 = vmatpush3.bf16.msra.mxu1 %v1891_v55 }
 0x17f   :  { %1771 = vmatmul.mubr.msk.bf16.vlgmr.msra.gmra.mrb[0].mxu1 %vm1554_vm7, %v1555_v61 }
 0x180   :  { %1774 = vmatprep.mubr.msk.bf16.mxu1 %vm1557_vm8, %v1558_v20 }
 0x187   :  { %1775 = vmatmul.mubr.msk.bf16.gmra.mrb[4].mxu1 %vm1560_vm9, %v2644_v41 }
 0x188   :  { %1778 = vmatprep.mubr.msk.bf16.mxu1 %vm1563_vm10, %v1564_v6 }
 0x18f   :  { %1779 = vmatmul.mubr.msk.bf16.gmra.mrb[8].mxu1 %vm1566_vm12, %v1567_v3 }
 0x252   :  { %v1772_v35 = vpop.f32.mrb[0].mxu1 }
 0x253   :  { %v1279_v63 = vadd.f32 %v1772_v35, %v1569_v57  ;;  %v1211_v58 = vpop.f32.mrb[1].mxu1 }
 0x254   :  { %v1277_v34 = vadd.f32 %v1569_v57, %v1211_v58  ;;  %v1773_v61 = vpop.f32.mrb[2].mxu1 }
 0x255   :  { %v1280_v0 = vadd.f32 %v1773_v61, %v1569_v57  ;;  %v1214_v9 = vpop.f32.mrb[3].mxu1  ;;  %v1291_v11 = vmax.f32 %v1279_v63, 0.0 }
 0x256   :  { %v1278_v29 = vadd.f32 %v1569_v57, %v1214_v9  ;;  %v1289_v30 = vmax.f32 %v1277_v34, 0.0 }
 0x257   :  { %v1292_v12 = vmax.f32 %v1280_v0, 0.0 }
 0x258   :  { %v1290_v36 = vmax.f32 %v1278_v29, 0.0 }
 0x259   :  { %v1302_v43 = vpack.c.bf16 %v1292_v12, %v1291_v11 }
 0x25a   :  { %v1301_v50 = vpack.c.bf16 %v1290_v36, %v1289_v30  ;;  %v1776_v2 = vpop.f32.mrb[4].mxu1 }
 0x25b   :  { %v1283_v27 = vadd.f32 %v1776_v2, %v1569_v57  ;;  %v1227_v14 = vpop.f32.mrb[5].mxu1 }
 0x25c   :  { %v1281_v40 = vadd.f32 %v1569_v57, %v1227_v14  ;;  %v1777_v48 = vpop.f32.mrb[6].mxu1  ;;  %1798 = vmatprep.mubr.bf16.mxu0 %v1301_v50 }
 0x25d   :  { %v1284_v5 = vadd.f32 %v1777_v48, %v1569_v57  ;;  %v1230_v20 = vpop.f32.mrb[7].mxu1  ;;  %1799 = vmatmul.mubr.bf16.vlgmr.msra.gmra.mrb[12].mxu0 %v1302_v43  ;;  %v1295_v23 = vmax.f32 %v1283_v27, 0.0 }
 0x25e   :  { %v1282_v19 = vadd.f32 %v1569_v57, %v1230_v20  ;;  %v1293_v44 = vmax.f32 %v1281_v40, 0.0 }
 0x25f   :  { %v1296_v38 = vmax.f32 %v1284_v5, 0.0 }
 0x260   :  { %v1294_v37 = vmax.f32 %v1282_v19, 0.0 }
 0x261   :  { %v1304_v39 = vpack.c.bf16 %v1296_v38, %v1295_v23 }
 0x262   :  { %v1303_v18 = vpack.c.bf16 %v1294_v37, %v1293_v44  ;;  %v1780_v26 = vpop.f32.mrb[8].mxu1 }
 0x263   :  { %v1287_v53 = vadd.f32 %v1780_v26, %v1569_v57  ;;  %v1243_v54 = vpop.f32.mrb[9].mxu1 }
 0x264   :  { %v1285_v8 = vadd.f32 %v1569_v57, %v1243_v54  ;;  %v1781_v28 = vpop.f32.mrb[10].mxu1  ;;  %1802 = vmatprep.mubr.bf16.mxu0 %v1303_v18 }
 0x265   :  { %v1288_v32 = vadd.f32 %v1781_v28, %v1569_v57  ;;  %v1246_v62 = vpop.f32.mrb[11].mxu1  ;;  %1803 = vmatmul.mubr.bf16.gmra.mrb[16].mxu0 %v1304_v39  ;;  %v1299_v16 = vmax.f32 %v1287_v53, 0.0 }
 0x266   :  { %v1286_v24 = vadd.f32 %v1569_v57, %v1246_v62  ;;  %v1297_v56 = vmax.f32 %v1285_v8, 0.0 }
 0x267   :  { %v1300_v47 = vmax.f32 %v1288_v32, 0.0 }
 0x268   :  { %v1298_v15 = vmax.f32 %v1286_v24, 0.0 }
 0x269   :  { %v1306_v52 = vpack.c.bf16 %v1300_v47, %v1299_v16 }
 0x26a   :  { %v1305_v22 = vpack.c.bf16 %v1298_v15, %v1297_v56 }
 0x26c   :  { %1806 = vmatprep.mubr.bf16.mxu0 %v1305_v22 }
 0x26d   :  { %1807 = vmatmul.mubr.bf16.gmra.mrb[20].mxu0 %v1306_v52 }
 0x330   :  { %v1800_v6 = vpop.f32.mrb[12].mxu0 }
 0x331   :  { %v1421_v45 = vadd.f32 %v1800_v6, %v1570_v42  ;;  %v1412_v3 = vpop.f32.mrb[13].mxu0 }
 0x332   :  { %v1413_v31 = vadd.f32 %v1570_v42, %v1412_v3  ;;  %v1801_v1 = vpop.f32.mrb[14].mxu0 }
 0x333   :  { %1461 = vst [vmem:[#allocation5 + $0x10] sm:$0xff] %v1421_v45  ;;  %v1424_v33 = vadd.f32 %v1801_v1, %v1570_v42  ;;  %v1415_v51 = vpop.f32.mrb[15].mxu0 }
 0x334   :  { %1459 = vst [vmem:[#allocation5] sm:$0xff] %v1413_v31  ;;  %v1416_v60 = vadd.f32 %v1570_v42, %v1415_v51 }
 0x335   :  { %1462 = vst [vmem:[#allocation5 + $0x18] sm:$0xff] %v1424_v33 }
 0x336   :  { %1460 = vst [vmem:[#allocation5 + $0x8] sm:$0xff] %v1416_v60 }
 0x338   :  { %v1804_v21 = vpop.f32.mrb[16].mxu0 }
 0x339   :  { %v1437_v59 = vadd.f32 %v1804_v21, %v1570_v42  ;;  %v1428_v17 = vpop.f32.mrb[17].mxu0 }
 0x33a   :  { %v1429_v46 = vadd.f32 %v1570_v42, %v1428_v17  ;;  %v1805_v25 = vpop.f32.mrb[18].mxu0 }
 0x33b   :  { %1465 = vst [vmem:[#allocation5 + $0x30] sm:$0xff] %v1437_v59  ;;  %v1440_v7 = vadd.f32 %v1805_v25, %v1570_v42  ;;  %v1431_v49 = vpop.f32.mrb[19].mxu0 }
 0x33c   :  { %1463 = vst [vmem:[#allocation5 + $0x20] sm:$0xff] %v1429_v46  ;;  %v1432_v4 = vadd.f32 %v1570_v42, %v1431_v49 }
 0x33d   :  { %1466 = vst [vmem:[#allocation5 + $0x38] sm:$0xff] %v1440_v7 }
 0x33e   :  { %1464 = vst [vmem:[#allocation5 + $0x28] sm:$0xff] %v1432_v4 }
 0x340   :  { %v1808_v55 = vpop.f32.mrb[20].mxu0 }
 0x341   :  { %v1453_v41 = vadd.f32 %v1808_v55, %v1570_v42  ;;  %v1444_v13 = vpop.f32.mrb[21].mxu0 }
 0x342   :  { %v1445_v10 = vadd.f32 %v1570_v42, %v1444_v13  ;;  %v1809_v57 = vpop.f32.mrb[22].mxu0 }
 0x343   :  { %1469 = vst [vmem:[#allocation5 + $0x50] sm:$0xff] %v1453_v41  ;;  %v1456_v35 = vadd.f32 %v1809_v57, %v1570_v42  ;;  %v1447_v63 = vpop.f32.mrb[23].mxu0 }
 0x344   :  { %1467 = vst [vmem:[#allocation5 + $0x40] sm:$0xff] %v1445_v10  ;;  %v1448_v58 = vadd.f32 %v1570_v42, %v1447_v63 }
 0x345   :  { %1470 = vst [vmem:[#allocation5 + $0x58] sm:$0xff] %v1456_v35 }
 0x346   :  { %1468 = vst [vmem:[#allocation5 + $0x48] sm:$0xff] %v1448_v58 }
 0x347   :  { %1933 = shalt.err (!%p1930_p12)
}
 0x348   :  { %s1934_s18 = scalar_lea.hbm %s2618_s7, 1536 }
 0x349   :  { %p1935_p13 = scmp.ne.s32.totalorder %s2618_s7, %s1934_s18  ;;  %p1938_p0 = scmp.lt.u32.totalorder %s1934_s18, %s2618_s7 }
 0x34b   :  { %p1940_p1 = pnand %p1938_p0, %p1935_p13 }
 0x34d   :  { %1943 = shalt.err (!%p1940_p1)
}
 0x34e   :  { %s1953_s20 = smov 128   ;;  %s1954_s21 = smov 8  }
 0x34f   :  { %1482 = dma.vmem_to_hbm [thread:$0]  %s1477_s14, 1536, %s2618_s7, [#allocation4], %s1953_s20, %s1953_s20, %s1954_s21  }
 0x350   :  { %1946 = dma.done.wait [#allocation4], 1536  }
 0x351   :  { %1947 = vsyncadd [#allocation4], 4294965760 }
 0x352   :  { %1486 = vsyncpa [#allocation3], 1 }
 0x353   :  { %1487 = vsyncpa [#allocation4], 1 }

</bundles_post_ra>
